<compile_context>
chip_gen: v5e
topology: v5e:2x2
jax: 0.10.0
libtpu: 0.0.40
codegen_flags: <defaults>
</compile_context>

<pallas_src>
import math

import jax
import jax.numpy as jnp
from jax.experimental import pallas as pl
from jax.experimental.pallas import tpu as pltpu

_LOG2 = math.log(2.0)
_THRESHOLD = 20.0  # torch.nn.functional.softplus default threshold
_LANES = 128


def _cdiv(a: int, b: int) -> int:
    return (a + b - 1) // b


def _round_up(x: int, m: int) -> int:
    return ((x + m - 1) // m) * m


def _sublane_pack(dtype) -> int:
    itemsize = jnp.dtype(dtype).itemsize
    return {4: 8, 2: 16, 1: 32}.get(itemsize, 8)


def _device_kind() -> str:
    try:
        return jax.devices()[0].device_kind.lower()
    except Exception:
        return ""


def _block_bytes_budget(kind: str) -> int:
    # Bytes per block buffer (one input tile == one output tile). Pallas
    # double-buffers each -> 4x this resident in VMEM.
    if ("v6" in kind) or ("v7" in kind) or ("7x" in kind):
        return 4 << 20  # v6e / v7x: 32 MiB scoped-VMEM default -> 16 MiB used
    return 2 << 20      # v5e (16 MiB scoped default) and unknown chips -> 8 MiB


def _softplus_shifted(x):
    # Numerically-stable softplus with PyTorch's threshold semantics:
    #   softplus(x) = x if x > threshold else log1p(exp(x))
    safe_x = jnp.minimum(x, _THRESHOLD)
    return jnp.where(x > _THRESHOLD, x, jnp.log1p(jnp.exp(safe_x))) - _LOG2


def _make_kernel(compute_dtype):
    def kernel(x_ref, o_ref):
        x = x_ref[...].astype(compute_dtype)
        o_ref[...] = _softplus_shifted(x).astype(o_ref.dtype)
    return kernel


def shifted_softplus(x: jax.Array) -> jax.Array:
    """Applies ShiftedSoftplus elementwise via a Pallas TPU kernel."""
    orig_shape = x.shape
    orig_dtype = x.dtype
    n = x.size
    if n == 0:
        return x  # empty tensor: nothing to do (avoids a 0-sized grid)

    kind = _device_kind()
    is_v5e = ("v5e" in kind) or ("v5 lite" in kind) or ("v5lite" in kind)

    # bf16/f16: compute in input dtype on chips with a bf16 EUP (v6e/v7x);
    # keep f32 math for f32 inputs and on v5e (no bf16 EUP there).
    if orig_dtype in (jnp.dtype(jnp.bfloat16), jnp.dtype(jnp.float16)) and not is_v5e:
        compute_dtype = orig_dtype
    else:
        compute_dtype = jnp.float32

    flat = x.reshape(-1)
    rows = n // _LANES
    n_main = rows * _LANES
    rem = n - n_main

    # Tiny tensors (< one 128-lane row): plain jnp is cheaper than a kernel.
    if rows == 0:
        out = _softplus_shifted(flat.astype(compute_dtype)).astype(orig_dtype)
        return out.reshape(orig_shape)

    # Fast path is zero-copy: no slice when n is a multiple of 128.
    x_main = flat if rem == 0 else flat[:n_main]
    x2d = x_main.reshape(rows, _LANES)

    itemsize = jnp.dtype(orig_dtype).itemsize
    pack = _sublane_pack(orig_dtype)
    tile_rows = max(pack, _block_bytes_budget(kind) // (_LANES * itemsize))

    # Keep at least 2 grid steps whenever possible so the "parallel" axis can
    # shard across v7x's two TensorCores (negligible cost on single-TC chips).
    tr = max(pack, min(tile_rows, _round_up(_cdiv(rows, 2), pack)))
    grid = (_cdiv(rows, tr),)

    cost = pl.CostEstimate(
        flops=5 * n_main,
        transcendentals=2 * n_main,
        bytes_accessed=2 * n_main * itemsize,
    )

    out2d = pl.pallas_call(
        _make_kernel(compute_dtype),
        out_shape=jax.ShapeDtypeStruct((rows, _LANES), orig_dtype),
        grid_spec=pltpu.PrefetchScalarGridSpec(
            num_scalar_prefetch=0,
            grid=grid,
            in_specs=[pl.BlockSpec((tr, _LANES), lambda i: (i, 0))],
            out_specs=pl.BlockSpec((tr, _LANES), lambda i: (i, 0)),
        ),
        compiler_params=pltpu.CompilerParams(
            dimension_semantics=("parallel",),
        ),
        cost_estimate=cost,
    )(x2d)

    out_flat = out2d.reshape(-1)

    if rem:
        # Ragged tail (< 128 elements): finish in plain jnp instead of
        # padding/slicing the whole tensor.
        tail = _softplus_shifted(flat[n_main:].astype(compute_dtype)).astype(orig_dtype)
        out_flat = jnp.concatenate([out_flat, tail])

    return out_flat.reshape(orig_shape)


if __name__ == "__main__":
    key = jax.random.PRNGKey(0)

    # NCHW-style activation, consistent with conv-style usage of this module.
    x = jax.random.normal(key, (2, 4, 16, 16), dtype=jnp.float32) * 3.0
    y = shifted_softplus(x)
    jax.block_until_ready(y)

    ref = jnp.where(x > _THRESHOLD, x,
                    jnp.log1p(jnp.exp(jnp.minimum(x, _THRESHOLD)))) - _LOG2
    assert y.shape == x.shape and y.dtype == x.dtype
    assert jnp.allclose(y, ref, atol=1e-5, rtol=1e-5)

    # Exercise the bf16 path (bf16 compute on v6e/v7x, f32 compute on v5e).
    xb = (jax.random.normal(jax.random.PRNGKey(1), (2, 4, 16, 16)) * 3.0).astype(jnp.bfloat16)
    yb = shifted_softplus(xb)
    jax.block_until_ready(yb)
    refb = (jnp.log1p(jnp.exp(jnp.minimum(xb.astype(jnp.float32), _THRESHOLD))) - _LOG2)
    assert yb.shape == xb.shape and yb.dtype == xb.dtype
    assert jnp.allclose(yb.astype(jnp.float32), refb, atol=0.05, rtol=0.05)

    # Exercise the ragged-tail path (element count not a multiple of 128).
    xr = jax.random.normal(jax.random.PRNGKey(2), (10, 130), dtype=jnp.float32) * 3.0
    yr = shifted_softplus(xr)
    jax.block_until_ready(yr)
    refr = jnp.where(xr > _THRESHOLD, xr,
                     jnp.log1p(jnp.exp(jnp.minimum(xr, _THRESHOLD)))) - _LOG2
    assert yr.shape == xr.shape and yr.dtype == xr.dtype
    assert jnp.allclose(yr, refr, atol=1e-5, rtol=1e-5)

    print("KERNEL_OK")
</pallas_src>

<mosaic_0001>
module attributes {stable_mosaic.version = 11 : i64} {
  func.func @kernel(%arg0: i32, %arg1: memref<8x128xf32, #tpu.memory_space<vmem>>, %arg2: memref<8x128xf32, #tpu.memory_space<vmem>>) attributes {dimension_semantics = [#tpu.dimension_semantics<parallel>], iteration_bounds = array<i64: 2>, scalar_prefetch = 0 : i64, scratch_operands = 0 : i64, tpu.core_type = #tpu.core_type<tc>, window_params = [{transform_indices = @transform_0, window_bounds = array<i64: 8, 128>}, {transform_indices = @transform_1, window_bounds = array<i64: 8, 128>}]} {
    %c0 = arith.constant 0 : index
    %c0_0 = arith.constant 0 : index
    %0 = vector.load %arg1[%c0, %c0_0] : memref<8x128xf32, #tpu.memory_space<vmem>>, vector<8x128xf32>
    %cst = arith.constant 2.000000e+01 : f32
    %1 = vector.broadcast %cst : f32 to vector<8x128xf32>
    %2 = arith.minimumf %0, %1 : vector<8x128xf32>
    %cst_1 = arith.constant 2.000000e+01 : f32
    %3 = vector.broadcast %cst_1 : f32 to vector<8x128xf32>
    %4 = arith.cmpf ogt, %0, %3 : vector<8x128xf32>
    %5 = math.exp %2 : vector<8x128xf32>
    %6 = math.log1p %5 : vector<8x128xf32>
    %7 = arith.select %4, %0, %6 : vector<8x128xi1>, vector<8x128xf32>
    %cst_2 = arith.constant 0.693147182 : f32
    %8 = vector.broadcast %cst_2 : f32 to vector<8x128xf32>
    %9 = arith.subf %7, %8 : vector<8x128xf32>
    %c0_3 = arith.constant 0 : index
    %c0_4 = arith.constant 0 : index
    %10 = vector.load %arg2[%c0_3, %c0_4] : memref<8x128xf32, #tpu.memory_space<vmem>>, vector<8x128xf32>
    tpu.vector_store %arg2[%c0_3, %c0_4], %9 {strides = array<i32>} : memref<8x128xf32, #tpu.memory_space<vmem>>, vector<8x128xf32>,
    return
  }
  func.func @transform_0(%arg0: i32) -> (i32, i32) {
    %c0_i32 = arith.constant 0 : i32
    %c0_i32_0 = arith.constant 0 : i32
    return %arg0, %c0_i32 : i32, i32
  }
  func.func @transform_1(%arg0: i32) -> (i32, i32) {
    %c0_i32 = arith.constant 0 : i32
    %c0_i32_0 = arith.constant 0 : i32
    return %arg0, %c0_i32 : i32, i32
  }
}

</mosaic_0001>

<bundles_post_ra>
// kernel: tpu_custom_call.1
= control target key start
LH: loop header
LB: loop body
LE: loop exit
PB: predicated region body
PF: predicated region fallthrough
CT: control target
= control target key end

     0   :  { %6 = vsyncpa [#allocation3], 0  ;;  %s535_s0 = inlined_call_operand.hbm [shape: f32[16,128], index: 0, kind: input, shape index: {}]   ;;  %s536_s1 = inlined_call_operand.hbm [shape: f32[16,128], index: 1, kind: output, shape index: {}]  }
   0x1   :  { %8 = vsyncpa [#allocation3 + $0x1], 0 }
   0x2   :  { %9 = vsyncpa [#allocation4], 0 }
   0x3   :  { %11 = vsyncpa [#allocation4 + $0x1], 0  ;;  %s408_s6 = smov 0   ;;  %s410_s7 = smov 0  }
   0x4   :  { %s412_s8 = smov 0   ;;  %s414_s9 = smov 0  }
   0x5 LB: > { %s429_s10 = sadd.s32 4294967295, %s396_s9   ;;  %s237_s11 = sadd.s32 4294967294, %s396_s9   ;;  %s396_s9 = sphi %s414_s9, %s546_s9   ;;  %s392_s8 = sphi %s412_s8, %s545_s8   ;;  %s388_s7 = sphi %s410_s7, %s544_s7   ;;  %s384_s6 = sphi %s408_s6, %s543_s6  }
   0x6   : > { %s433_s12 = sadd.s32 1, %s396_s9   ;;  %s24_s13 = sadd.s32 1, %s392_s8 }
   0x7   : > { %s21_s14 = ssub.s32 %s396_s9, %s433_s12  ;;  %p31_p0 = scmp.ne.s32.totalorder %s392_s8, %s388_s7 }
   0x8   : > { %p22_p1 = scmp.eq.s32.totalorder %s21_s14, 0  ;;  %p32_p2 = scmp.eq.s32.totalorder %s396_s9, 0 }
   0x9   : > { %p37_p3 = scmp.ne.s32.totalorder %s388_s7, %s384_s6  ;;  %p38_p4 = scmp.eq.s32.totalorder %s429_s10, 0 }
   0xa   : > { %s445_s15 = scalar_select %p22_p1, %s392_s8, %s24_s13  }
   0xb   : > { %p447_p5 = por %p32_p2, %p31_p0  ;;  %p451_p6 = por %p38_p4, %p37_p3 }
   0xc   : > { %p61_p7 = scmp.eq.s32.totalorder %s429_s10, 1  ;;  %p67_p8 = scmp.eq.s32.totalorder %s237_s11, 1 }
   0xd   : > { %p262_p10 = scmp.lt.s32.totalorder %s396_s9, 2  ;;  %s87_s20 = sand.u32 1, %s392_s8  }
   0xe   : > { %p458_p11 = por %p61_p7, %p31_p0  ;;  %p462_p12 = por %p67_p8, %p37_p3 }
   0xf   : > { %s241_s21 = sshll.u32 %s396_s9, 3  ;;  %s240_s22 = sshll.u32 %s87_s20, 3 }
  0x10   : > { %s95_s25 = scalar_lea.hbm %s535_s0, %s241_s21  ;;  %s91_s27 = scalar_lea.vmem [#allocation2], %s240_s22 }
  0x11   : > { %s97_s26 = sshll.u32 %s95_s25, 4  ;;  %s99_s28 = sshll.u32 %s91_s27, 4  ;;  %s98_s26 = int_to_ptr.hbm [resolvable:$true] %s97_s26  ;;  %s100_s28 = int_to_ptr.vmem [resolvable:$true] %s99_s28 }
  0x12   : > { %p473_p13 = pnand %p262_p10, %p447_p5  ;;  %p242_p0 = scmp.ge.s32.totalorder %s396_s9, 1 }
  0x13   : > { %p104_p1 = scmp.lt.s32.totalorder %s396_s9, 3  ;;  %s88_s30 = scalar_lea.sflag [#allocation3], %s87_s20 }
  0x14   : > { %s300_s2 = sshra.s32 %s98_s26, 4  ;;  %p304_p3 = pneg %p473_p13  ;;  %s301_s2 = int_to_ptr.hbm [resolvable:$true] %s300_s2 }
  0x15   : > { %s302_s3 = scalar_lea.hbm %s301_s2, 8  ;;  %s307_s11 = scalar_lea.hbm %s535_s0, 16 }
  0x16   : > { %p303_p2 = scmp.ne.s32.totalorder %s301_s2, %s302_s3  ;;  %p308_p5 = scmp.lt.s32.totalorder %s301_s2, %s535_s0 }
  0x17   : > { %p309_p8 = scmp.lt.s32.totalorder %s307_s11, %s302_s3 }
  0x18   : > { %p305_p4 = pnand %p304_p3, %p303_p2 }
  0x19   : > { %p310_p10 = por %p309_p8, %p308_p5 }
  0x1a   : > { %p306_p7 = pneg %p305_p4 }
  0x1c   : > { %p311_p9 = pnand %p310_p10, %p306_p7 }
  0x1e   : > { %314 = shalt.err (!%p311_p9)
}
  0x1f   : > { %257 = dma.hbm_to_vmem [thread:$0]  (!%p473_p13), %s98_s26, 128, %s100_s28, %s88_s30  }
  0x20   : > { %p105_p2 = pnand %p242_p0, %p104_p1 }
  0x21   : > { %s494_s16 = sand.u32 (!%p105_p2), 1, %s388_s7  }
  0x22   : > { %108 = sbr.rel (%p105_p2) target bundleno = 70 (0x46), region = 24  ;;  %s243_s20 = sshll.u32 (!%p105_p2), %s494_s16, 3 }
  0x23   : > { %s111_s21 = scalar_lea.sflag (!%p105_p2), [#allocation3], %s494_s16  ;;  %s114_s22 = scalar_lea.vmem (!%p105_p2), [#allocation2], %s243_s20 }
  0x27   : > { %375 = dma.done.wait (%p451_p6), %s111_s21, 128  }
  0x28   : > { %377 = vsyncadd (%p451_p6), %s111_s21, 4294967168  ;;  %v134_v0 = vld [vmem:[%s114_s22] sm:$0xff]  ;;  %s247_s23 = sshll.u32 %s429_s10, 3  ;;  %s133_s17 = scalar_lea.vmem [#allocation5], %s243_s20 }
  0x29   : > { %v135_v1 = vmin.f32 %v134_v0, 20.0  ;;  %s162_s26 = scalar_lea.hbm %s536_s1, %s247_s23  ;;  %vm136_vm1 = vcmp.gt.f32.partialorder %v134_v0, 20.0  ;;  %s164_s27 = sshll.u32 %s133_s17, 4  ;;  %s165_s27 = int_to_ptr.vmem [resolvable:$true] %s164_s27 }
  0x2a   : > { %s166_s28 = sshll.u32 %s162_s26, 4  ;;  %s152_s10 = scalar_lea.sflag [#allocation4], %s494_s16  ;;  %s167_s28 = int_to_ptr.hbm [resolvable:$true] %s166_s28 }
  0x2b   : > { %v137_v2 = vmul.f32 1.442695, %v135_v1  ;;  %s344_s29 = sshra.s32 %s167_s28, 4  ;;  %s350_s4 = scalar_lea.hbm %s536_s1, 16  ;;  %s345_s29 = int_to_ptr.hbm [resolvable:$true] %s344_s29 }
  0x2c   : > { %s346_s30 = scalar_lea.hbm %s345_s29, 8  ;;  %p351_p0 = scmp.lt.s32.totalorder %s345_s29, %s536_s1 }
  0x2d   : > { %296 = vpow2.f32 %v137_v2  ;;  %p347_p6 = scmp.ne.s32.totalorder %s345_s29, %s346_s30  ;;  %p352_p1 = scmp.lt.s32.totalorder %s350_s4, %s346_s30 }
  0x2f   : > { %p348_p9 = pnand %p347_p6, %p458_p11  ;;  %p353_p3 = por %p352_p1, %p351_p0 }
  0x31   : > { %p349_p13 = pneg %p348_p9 }
  0x33   : > { %v297_v3 = vpop.eup %296  ;;  %p354_p4 = pnand %p353_p3, %p349_p13 }
  0x34   : > { %v139_v4 = vadd.f32 1.0, %v297_v3  ;;  %v142_v5 = vmul.f32 -0.5, %v297_v3  ;;  %v145_v7 = vand.u32 2147483647, %v297_v3 }
  0x36   : > { %298 = vlog2.f32 %v139_v4  ;;  %v143_v6 = vadd.f32 1.0, %v142_v5  ;;  %vm146_vm0 = vcmp.lt.f32.partialorder %v145_v7, 0.0004427343 }
  0x38   : > { %v144_v8 = vmul.f32 %v297_v3, %v143_v6 }
  0x3c   : > { %v299_v9 = vpop.eup %298 }
  0x3d   : > { %v141_v10 = vmul.f32 0.6931472, %v299_v9 }
  0x3f   : > { %v147_v11 = vsel %vm146_vm0, %v144_v8, %v141_v10 }
  0x40   : > { %v148_v12 = vsel %vm136_vm1, %v134_v0, %v147_v11 }
  0x41   : > { %v245_v13 = vadd.f32 -0.6931472, %v148_v12 }
  0x43   : > { %150 = vst [vmem:[%s133_s17] sm:$0xff] %v245_v13 }
  0x44   : > { %357 = shalt.err (!%p354_p4)
}
  0x45   : > { %252 = dma.vmem_to_hbm [thread:$0]  (%p458_p11), %s165_s27, 128, %s167_s28, %s152_s10  }
  0x46 PF: > { %s178_s13 = sand.u32 1, %s384_s6   ;;  %p542_p7 = scmp.ge.s32.totalorder %s396_s9, 2 }
  0x47   : > { %s179_s14 = scalar_lea.sflag [#allocation4], %s178_s13 }
  0x48   : > { %p259_p5 = pnand %p542_p7, %p462_p12 }
  0x4a   : > { %p260_p8 = pneg %p259_p5 }
  0x4c   : > { %379 = dma.done.wait (%p260_p8), %s179_s14, 128  }
  0x4d   : > { %381 = vsyncadd (%p260_p8), %s179_s14, 4294967168  ;;  %p14_p10 = scmp.ge.s32.totalorder %s433_s12, 4   ;;  %s543_s6 = smov %s388_s7 }
  0x4e   : > { %s544_s7 = smov %s392_s8  ;;  %s545_s8 = smov %s445_s15 }
  0x4f   : > { %s546_s9 = smov %s433_s12  ;;  %16 = sbr.rel (!%p14_p10) target bundleno = 5 (0x5), region = 69 }
  0x54   :  { %185 = vsyncpa [#allocation3], 1 }
  0x55   :  { %187 = vsyncpa [#allocation3 + $0x1], 1 }
  0x56   :  { %188 = vsyncpa [#allocation4], 1 }
  0x57   :  { %190 = vsyncpa [#allocation4 + $0x1], 1 }

</bundles_post_ra>
